<compile_context>
chip_gen: v7x
topology: tpu7x:2x2x1
jax: 0.10.0
libtpu: 0.0.40
codegen_flags: <defaults>
</compile_context>

<pallas_src>
import jax
import jax.numpy as jnp
from jax.experimental import pallas as pl
from jax.experimental.pallas import tpu as pltpu


def _round_up(x, m):
    return ((x + m - 1) // m) * m


def _linear_block_kernel(x_ref, w_ref, b_ref, o_ref):
    # x_ref: (1, C_in, T)   activation tile in caller dtype (spatial on the lane axis)
    # w_ref: (C_out, C_in)  bf16 1x1-conv weight with BN scale folded in (resident)
    # b_ref: (C_out, 1)     f32 folded BN bias (resident)
    # o_ref: (1, C_out, T)  output tile (lane-dense along spatial)
    x = x_ref[0].astype(jnp.bfloat16)   # in-kernel cast: x streams from HBM exactly once
    acc = jnp.dot(w_ref[...], x, preferred_element_type=jnp.float32)
    o_ref[0] = (acc + b_ref[...]).astype(o_ref.dtype)


def _vmem_estimate_bytes(c_in, c_out, t, x_bytes, out_bytes):
    ci = _round_up(c_in, 8)
    co = _round_up(c_out, 8)
    x_buf = 2 * ci * t * x_bytes             # double-buffered streamed input tile
    o_buf = 2 * co * t * out_bytes           # double-buffered output tile
    w_buf = co * _round_up(c_in, 128) * 2    # resident bf16 folded weight (single buffer)
    b_buf = co * 128 * 4                     # resident bias, lane-padded (single buffer)
    return x_buf + o_buf + w_buf + b_buf


def _vmem_capacity_bytes():
    try:
        return int(pltpu.get_tpu_info().vmem_capacity_bytes)   # 128 MiB v5e/v6e, 64 MiB v7x
    except Exception:
        return 64 * 1024 * 1024  # conservative fallback (v7x per-core VMEM)


def _pick_spatial_tile(hw, c_in, c_out, x_bytes, out_bytes, n_batch, vmem_budget, t_max):
    """Pick the lane tile T (a multiple of 128, or exactly HW)."""
    if hw <= t_max and _vmem_estimate_bytes(
            c_in, c_out, _round_up(hw, 128), x_bytes, out_bytes) <= vmem_budget:
        t = hw                                   # whole spatial extent in one block
    else:
        t_cap = min(t_max, _round_up(hw, 128))
        t = 128
        while (2 * t <= t_cap and
               _vmem_estimate_bytes(c_in, c_out, 2 * t, x_bytes, out_bytes) <= vmem_budget):
            t *= 2
    # v7x megacore: with a single batch, keep >= 2 grid steps on the spatial axis.
    if n_batch == 1 and hw > 128 and pl.cdiv(hw, t) < 2:
        t = max(128, _round_up((hw + 1) // 2, 128))
    return t


def linear_block_pallas(x_nchw, weight, gamma, beta, running_mean, running_var,
                        *, eps=1e-5, tile_hw=8192, out_dtype=None):
    """Conv2d(in_c, out_c, 1x1, stride 1, pad 0, groups 1, bias=False) + BatchNorm2d (eval)."""
    n, c_in, h, w_sp = x_nchw.shape
    c_out, c_in_w, kh, kw = weight.shape
    assert (kh, kw) == (1, 1) and c_in_w == c_in, "only 1x1 / stride 1 / groups 1 supported"
    # On v5e, pass out_dtype=jnp.bfloat16 when the consumer tolerates it (halves store bytes).
    out_dtype = out_dtype or x_nchw.dtype

    # ---- Fold eval-mode BN into the conv weight and a per-channel bias (fold in f32) ----
    scale = gamma.astype(jnp.float32) / jnp.sqrt(running_var.astype(jnp.float32) + eps)
    bias_col = (beta.astype(jnp.float32)
                - running_mean.astype(jnp.float32) * scale).reshape(c_out, 1)        # (C_out,1) f32
    w_folded = (weight.reshape(c_out, c_in).astype(jnp.float32)
                * scale[:, None]).astype(jnp.bfloat16)                               # (C_out,C_in) bf16

    # ---- NCHW -> (N, C_in, HW): free reshape, no transpose, no dtype cast ----
    hw = h * w_sp
    x3 = x_nchw.reshape(n, c_in, hw)

    # ---- Generation-aware tile / VMEM policy ----
    x_bytes = jnp.dtype(x3.dtype).itemsize
    out_bytes = jnp.dtype(out_dtype).itemsize
    vmem_cap = _vmem_capacity_bytes()
    vmem_budget = vmem_cap // 2
    t = _pick_spatial_tile(hw, c_in, c_out, x_bytes, out_bytes, n, vmem_budget, tile_hw)
    grid = (n, pl.cdiv(hw, t))                   # partial last tile is masked by Pallas (no pad/slice)
    est = _vmem_estimate_bytes(c_in, c_out, _round_up(t, 128), x_bytes, out_bytes)
    vmem_limit = int(min(max(est + 2 * 1024 * 1024, 8 * 1024 * 1024),
                         (3 * vmem_cap) // 4))   # ~96 MiB v5e/v6e, ~48 MiB v7x

    def make_call(single_buffer_resident):
        resident_kw = {}
        if single_buffer_resident and hasattr(pl, "Buffered"):
            # Constant index_map -> double buffering the resident weight/bias buys nothing.
            resident_kw = dict(pipeline_mode=pl.Buffered(buffer_count=1))
        grid_spec = pltpu.PrefetchScalarGridSpec(
            num_scalar_prefetch=0,
            grid=grid,
            in_specs=[
                # TODO(synk): sweep pipeline_mode=pl.Buffered(3) here if xprof shows the
                # input DMA still exposed after the larger tiles (keep only if measured).
                pl.BlockSpec((1, c_in, t), lambda b, j: (b, 0, j)),                   # streamed x tile
                pl.BlockSpec((c_out, c_in), lambda b, j: (0, 0), **resident_kw),      # resident weight
                pl.BlockSpec((c_out, 1), lambda b, j: (0, 0), **resident_kw),         # resident bias
            ],
            out_specs=pl.BlockSpec((1, c_out, t), lambda b, j: (b, 0, j)),
        )
        return pl.pallas_call(
            _linear_block_kernel,
            out_shape=jax.ShapeDtypeStruct((n, c_out, hw), out_dtype),
            grid_spec=grid_spec,
            compiler_params=pltpu.CompilerParams(
                dimension_semantics=("parallel", "parallel"),
                vmem_limit_bytes=vmem_limit),
        )

    try:
        out3 = make_call(True)(x3, w_folded, bias_col)
    except Exception:
        # pl.Buffered(1) hint not supported by this jax version -> plain double-buffered specs.
        out3 = make_call(False)(x3, w_folded, bias_col)

    # (N, C_out, HW) -> NCHW. Free reshape, no transpose, no slicing.
    return out3.reshape(n, c_out, h, w_sp)


def linear_block_reference(x_nchw, weight, gamma, beta, running_mean, running_var, eps=1e-5):
    """Plain-JAX f32 reference matching PyTorch Conv2d(1x1, bias=False) + BatchNorm2d.eval()."""
    y = jax.lax.conv_general_dilated(
        x_nchw, weight, window_strides=(1, 1), padding="VALID",
        dimension_numbers=("NCHW", "OIHW", "NCHW"))
    inv = 1.0 / jnp.sqrt(running_var + eps)
    y = (y - running_mean[None, :, None, None]) * inv[None, :, None, None]
    y = y * gamma[None, :, None, None] + beta[None, :, None, None]
    return y


if __name__ == "__main__":
    key = jax.random.PRNGKey(0)
    ks = jax.random.split(key, 12)

    # Case 1: batch=2, C_in=32, C_out=64, 16x16 spatial (HW=256, whole-extent tile).
    batch, in_c, out_c, side = 2, 32, 64, 16
    x = jax.random.normal(ks[0], (batch, in_c, side, side), dtype=jnp.float32)
    weight = jax.random.normal(ks[1], (out_c, in_c, 1, 1), dtype=jnp.float32) * 0.1
    gamma = jax.random.normal(ks[2], (out_c,), dtype=jnp.float32) * 0.1 + 1.0
    beta = jax.random.normal(ks[3], (out_c,), dtype=jnp.float32) * 0.1
    running_mean = jax.random.normal(ks[4], (out_c,), dtype=jnp.float32) * 0.1
    running_var = jax.random.uniform(ks[5], (out_c,), dtype=jnp.float32, minval=0.5, maxval=1.5)

    out = jax.block_until_ready(
        linear_block_pallas(x, weight, gamma, beta, running_mean, running_var))
    ref = linear_block_reference(x, weight, gamma, beta, running_mean, running_var)
    assert out.shape == (batch, out_c, side, side), out.shape
    err = float(jnp.max(jnp.abs(out - ref)))
    assert jnp.allclose(out, ref, atol=5e-2, rtol=5e-2), err   # bf16 MXU vs f32 reference

    # Case 2: batch=1, HW=400 (not a multiple of the 128-lane tile) -> exercises the
    # masked partial last block and the >=2-spatial-step clamp for v7x megacore.
    x2 = jax.random.normal(ks[6], (1, 8, 20, 20), dtype=jnp.float32)
    w2 = jax.random.normal(ks[7], (16, 8, 1, 1), dtype=jnp.float32) * 0.1
    g2 = jax.random.normal(ks[8], (16,), dtype=jnp.float32) * 0.1 + 1.0
    b2 = jax.random.normal(ks[9], (16,), dtype=jnp.float32) * 0.1
    m2 = jax.random.normal(ks[10], (16,), dtype=jnp.float32) * 0.1
    v2 = jax.random.uniform(ks[11], (16,), dtype=jnp.float32, minval=0.5, maxval=1.5)
    out2 = jax.block_until_ready(linear_block_pallas(x2, w2, g2, b2, m2, v2))
    ref2 = linear_block_reference(x2, w2, g2, b2, m2, v2)
    assert out2.shape == (1, 16, 20, 20), out2.shape
    err2 = float(jnp.max(jnp.abs(out2 - ref2)))
    assert jnp.allclose(out2, ref2, atol=5e-2, rtol=5e-2), err2

    print("KERNEL_OK")
</pallas_src>

<mosaic_0001>
module attributes {stable_mosaic.version = 11 : i64} {
  func.func @_linear_block_kernel(%arg0: i32, %arg1: i32, %arg2: memref<1x32x256xf32, #tpu.memory_space<vmem>>, %arg3: memref<64x32xbf16, #tpu.memory_space<vmem>>, %arg4: memref<64x1xf32, #tpu.memory_space<vmem>>, %arg5: memref<1x64x256xf32, #tpu.memory_space<vmem>>) attributes {dimension_semantics = [#tpu.dimension_semantics<parallel>, #tpu.dimension_semantics<parallel>], iteration_bounds = array<i64: 2, 1>, scalar_prefetch = 0 : i64, scratch_operands = 0 : i64, tpu.core_type = #tpu.core_type<tc>, window_params = [{transform_indices = @transform_0, window_bounds = array<i64: 1, 32, 256>}, {pipeline_mode = #tpu.pipeline_mode<synchronous>, transform_indices = @transform_1, window_bounds = array<i64: 64, 32>}, {pipeline_mode = #tpu.pipeline_mode<synchronous>, transform_indices = @transform_2, window_bounds = array<i64: 64, 1>}, {transform_indices = @transform_3, window_bounds = array<i64: 1, 64, 256>}]} {
    %c0 = arith.constant 0 : index
    %c0_0 = arith.constant 0 : index
    %c0_1 = arith.constant 0 : index
    %0 = vector.load %arg2[%c0, %c0_0, %c0_1] : memref<1x32x256xf32, #tpu.memory_space<vmem>>, vector<1x32x256xf32>
    %1 = vector.shape_cast %0 : vector<1x32x256xf32> to vector<32x256xf32>
    %2 = arith.truncf %1 : vector<32x256xf32> to vector<32x256xbf16>
    %c0_2 = arith.constant 0 : index
    %c0_3 = arith.constant 0 : index
    %3 = vector.load %arg3[%c0_2, %c0_3] : memref<64x32xbf16, #tpu.memory_space<vmem>>, vector<64x32xbf16>
    %cst = arith.constant dense<0.000000e+00> : vector<64x256xf32>
    %4 = tpu.matmul %3, %2, %cst {dimension_numbers = #tpu.dot_dimension_numbers<[1], [0], [0], [1], [0, 0, 1, 1], [], []>} : vector<64x32xbf16>, vector<32x256xbf16>, vector<64x256xf32> -> vector<64x256xf32>
    %c0_4 = arith.constant 0 : index
    %c0_5 = arith.constant 0 : index
    %5 = vector.load %arg4[%c0_4, %c0_5] : memref<64x1xf32, #tpu.memory_space<vmem>>, vector<64x1xf32>
    %6 = vector.broadcast %5 : vector<64x1xf32> to vector<64x256xf32>
    %7 = arith.addf %4, %6 : vector<64x256xf32>
    %c0_6 = arith.constant 0 : index
    %c0_7 = arith.constant 0 : index
    %c0_8 = arith.constant 0 : index
    %8 = vector.load %arg5[%c0_6, %c0_7, %c0_8] : memref<1x64x256xf32, #tpu.memory_space<vmem>>, vector<1x64x256xf32>
    %9 = vector.shape_cast %8 : vector<1x64x256xf32> to vector<64x256xf32>
    %10 = vector.shape_cast %7 : vector<64x256xf32> to vector<1x64x256xf32>
    tpu.vector_store %arg5[%c0_6, %c0_7, %c0_8], %10 {strides = array<i32>} : memref<1x64x256xf32, #tpu.memory_space<vmem>>, vector<1x64x256xf32>,
    return
  }
  func.func @transform_0(%arg0: i32, %arg1: i32) -> (i32, i32, i32) {
    %c0_i32 = arith.constant 0 : i32
    %c0_i32_0 = arith.constant 0 : i32
    return %arg0, %c0_i32, %arg1 : i32, i32, i32
  }
  func.func @transform_1(%arg0: i32, %arg1: i32) -> (i32, i32) {
    %c0_i32 = arith.constant 0 : i32
    %c0_i32_0 = arith.constant 0 : i32
    %c0_i32_1 = arith.constant 0 : i32
    return %c0_i32, %c0_i32_0 : i32, i32
  }
  func.func @transform_2(%arg0: i32, %arg1: i32) -> (i32, i32) {
    %c0_i32 = arith.constant 0 : i32
    %c0_i32_0 = arith.constant 0 : i32
    %c0_i32_1 = arith.constant 0 : i32
    return %c0_i32, %c0_i32_0 : i32, i32
  }
  func.func @transform_3(%arg0: i32, %arg1: i32) -> (i32, i32, i32) {
    %c0_i32 = arith.constant 0 : i32
    %c0_i32_0 = arith.constant 0 : i32
    return %arg0, %c0_i32, %arg1 : i32, i32, i32
  }
}

module attributes {stable_mosaic.version = 11 : i64} {
  func.func @_linear_block_kernel(%arg0: i32, %arg1: i32, %arg2: memref<1x32x256xf32, #tpu.memory_space<vmem>>, %arg3: memref<64x32xbf16, #tpu.memory_space<vmem>>, %arg4: memref<64x1xf32, #tpu.memory_space<vmem>>, %arg5: memref<1x64x256xf32, #tpu.memory_space<vmem>>) attributes {dimension_semantics = [#tpu.dimension_semantics<parallel>, #tpu.dimension_semantics<parallel>], iteration_bounds = array<i64: 2, 1>, scalar_prefetch = 0 : i64, scratch_operands = 0 : i64, tpu.core_type = #tpu.core_type<tc>, window_params = [{transform_indices = @transform_0, window_bounds = array<i64: 1, 32, 256>}, {pipeline_mode = #tpu.pipeline_mode<synchronous>, transform_indices = @transform_1, window_bounds = array<i64: 64, 32>}, {pipeline_mode = #tpu.pipeline_mode<synchronous>, transform_indices = @transform_2, window_bounds = array<i64: 64, 1>}, {transform_indices = @transform_3, window_bounds = array<i64: 1, 64, 256>}]} {
    %c0 = arith.constant 0 : index
    %c0_0 = arith.constant 0 : index
    %c0_1 = arith.constant 0 : index
    %0 = vector.load %arg2[%c0, %c0_0, %c0_1] : memref<1x32x256xf32, #tpu.memory_space<vmem>>, vector<1x32x256xf32>
    %1 = vector.shape_cast %0 : vector<1x32x256xf32> to vector<32x256xf32>
    %2 = arith.truncf %1 : vector<32x256xf32> to vector<32x256xbf16>
    %c0_2 = arith.constant 0 : index
    %c0_3 = arith.constant 0 : index
    %3 = vector.load %arg3[%c0_2, %c0_3] : memref<64x32xbf16, #tpu.memory_space<vmem>>, vector<64x32xbf16>
    %cst = arith.constant dense<0.000000e+00> : vector<64x256xf32>
    %4 = tpu.matmul %3, %2, %cst {dimension_numbers = #tpu.dot_dimension_numbers<[1], [0], [0], [1], [0, 0, 1, 1], [], []>} : vector<64x32xbf16>, vector<32x256xbf16>, vector<64x256xf32> -> vector<64x256xf32>
    %c0_4 = arith.constant 0 : index
    %c0_5 = arith.constant 0 : index
    %5 = vector.load %arg4[%c0_4, %c0_5] : memref<64x1xf32, #tpu.memory_space<vmem>>, vector<64x1xf32>
    %6 = vector.broadcast %5 : vector<64x1xf32> to vector<64x256xf32>
    %7 = arith.addf %4, %6 : vector<64x256xf32>
    %c0_6 = arith.constant 0 : index
    %c0_7 = arith.constant 0 : index
    %c0_8 = arith.constant 0 : index
    %8 = vector.load %arg5[%c0_6, %c0_7, %c0_8] : memref<1x64x256xf32, #tpu.memory_space<vmem>>, vector<1x64x256xf32>
    %9 = vector.shape_cast %8 : vector<1x64x256xf32> to vector<64x256xf32>
    %10 = vector.shape_cast %7 : vector<64x256xf32> to vector<1x64x256xf32>
    tpu.vector_store %arg5[%c0_6, %c0_7, %c0_8], %10 {strides = array<i32>} : memref<1x64x256xf32, #tpu.memory_space<vmem>>, vector<1x64x256xf32>,
    return
  }
  func.func @transform_0(%arg0: i32, %arg1: i32) -> (i32, i32, i32) {
    %c0_i32 = arith.constant 0 : i32
    %c0_i32_0 = arith.constant 0 : i32
    return %arg0, %c0_i32, %arg1 : i32, i32, i32
  }
  func.func @transform_1(%arg0: i32, %arg1: i32) -> (i32, i32) {
    %c0_i32 = arith.constant 0 : i32
    %c0_i32_0 = arith.constant 0 : i32
    %c0_i32_1 = arith.constant 0 : i32
    return %c0_i32, %c0_i32_0 : i32, i32
  }
  func.func @transform_2(%arg0: i32, %arg1: i32) -> (i32, i32) {
    %c0_i32 = arith.constant 0 : i32
    %c0_i32_0 = arith.constant 0 : i32
    %c0_i32_1 = arith.constant 0 : i32
    return %c0_i32, %c0_i32_0 : i32, i32
  }
  func.func @transform_3(%arg0: i32, %arg1: i32) -> (i32, i32, i32) {
    %c0_i32 = arith.constant 0 : i32
    %c0_i32_0 = arith.constant 0 : i32
    return %arg0, %c0_i32, %arg1 : i32, i32, i32
  }
}

</mosaic_0001>

<bundles_post_ra>
// kernel: tpu_custom_call.1
= control target key start
LH: loop header
LB: loop body
LE: loop exit
PB: predicated region body
PF: predicated region fallthrough
CT: control target
= control target key end

     0   :  { %8 = vsyncpa [#allocation3], 0  ;;  %s981_s0 = inlined_call_operand.hbm [shape: f32[2,32,256], index: 0, kind: input, shape index: {}]   ;;  %s982_s1 = inlined_call_operand.vmem [shape: bf16[64,32], index: 1, kind: input, shape index: {}]   ;;  %s983_s2 = inlined_call_operand.vmem [shape: f32[64,1], index: 2, kind: input, shape index: {}]   ;;  %s984_s3 = inlined_call_operand.hbm [shape: f32[2,64,256], index: 3, kind: output, shape index: {}]  }
   0x1   :  { %10 = vsyncpa [#allocation3 + $0x1], 0 }
   0x2   :  { %11 = vsyncpa [#allocation4], 0 }
   0x3   :  { %13 = vsyncpa [#allocation4 + $0x1], 0  ;;  %s746_s12 = smov 0   ;;  %s748_s13 = smov 0  }
   0x4   :  { %s750_s14 = smov 0   ;;  %s752_s15 = smov 0  }
   0x5   :  { %s754_s16 = smov 0   ;;  %s756_s17 = smov 0  }
   0x6 LB: > { %s503_s18 = sadd.s32 4294967295, %s717_s17   ;;  %s504_s19 = sadd.s32 4294967294, %s717_s17   ;;  %s717_s17 = sphi %s756_s17, %s19_s17   ;;  %s713_s16 = sphi %s754_s16, %s999_s16   ;;  %s709_s15 = sphi %s752_s15, %s998_s15   ;;  %s705_s14 = sphi %s750_s14, %s997_s14   ;;  %s701_s13 = sphi %s748_s13, %s996_s13   ;;  %s697_s12 = sphi %s746_s12, %s995_s12  }
   0x7   : > { %s31_s20 = sadd.s32 1, %s713_s16  ;;  %s40_s21 = sadd.s32 1, %s705_s14 }
   0x8   : > { %p33_p0 = scmp.ge.s32.totalorder %s31_s20, 2  ;;  %p47_p1 = scmp.ne.s32.totalorder %s705_s14, %s701_s13 }
   0x9   : > { %p48_p2 = scmp.eq.s32.totalorder %s717_s17, 0  ;;  %p53_p3 = scmp.ne.s32.totalorder %s701_s13, %s697_s12 }
   0xa   : > { %s1001_s20 = smov (%p33_p0, %s31_s20), 0  ;;  %p54_p5 = scmp.eq.s32.totalorder %s503_s18, 0 }
   0xb   : > { %p787_p4 = por %p48_p2, %p47_p1  ;;  %s35_s23 = ssub.s32 %s713_s16, %s1001_s20 }
   0xc   : > { %p121_p6 = scmp.eq.s32.totalorder %s503_s18, 1  ;;  %p38_p7 = scmp.eq.s32.totalorder %s35_s23, 0 }
   0xd   : > { %p793_p8 = por %p54_p5, %p53_p3  ;;  %p127_p10 = scmp.eq.s32.totalorder %s504_s19, 1 }
   0xe   : > { %p797_p9 = por %p121_p6, %p47_p1  ;;  %p544_p13 = scmp.lt.s32.totalorder %s717_s17, 2 }
   0xf   : > { %s802_s26 = scalar_select %p38_p7, %s705_s14, %s40_s21  }
  0x10   : > { %s988_s25 = scalar_select %p797_p9, 1, 0 }
  0x11   : > { %p804_p11 = por %p127_p10, %p53_p3  ;;  %s153_s28 = sand.u32 1, %s705_s14  }
  0x12   : > { %s507_s29 = sshll.u32 %s153_s28, 6  ;;  %s526_s30 = sshll.u32 %s713_s16, 10 }
  0x13   : > { %s989_s27 = scalar_select %p804_p11, 1, 0 }
  0x14   : > { %s815_s6 = scalar_lea.hbm %s981_s0, %s526_s30  ;;  %s157_s7 = scalar_lea.vmem [#allocation2], %s507_s29 }
  0x15   : > { %s166_s8 = sshll.u32 %s157_s7, 4  ;;  %p821_p0 = pnand %p544_p13, %p787_p4  ;;  %s817_s8 = int_to_ptr.vmem [resolvable:$true] %s166_s8 }
  0x16   : > { %s826_s10 = scalar_lea.sflag [#allocation3], %s153_s28  ;;  %s605_s11 = scalar_lea.hbm %s815_s6, 1024 }
  0x17   : > { %p606_p2 = scmp.ne.s32.totalorder %s815_s6, %s605_s11  ;;  %p607_p3 = pneg %p821_p0 }
  0x18   : > { %s610_s21 = scalar_lea.hbm %s981_s0, 2048  ;;  %p611_p4 = scmp.lt.u32.totalorder %s815_s6, %s981_s0 }
  0x19   : > { %p608_p5 = pnand %p607_p3, %p606_p2  ;;  %p612_p7 = scmp.lt.u32.totalorder %s610_s21, %s605_s11 }
  0x1a   : > { %p614_p13 = scmp.lt.u32.totalorder %s605_s11, %s815_s6 }
  0x1b   : > { %p609_p6 = pneg %p608_p5  ;;  %p613_p10 = por %p612_p7, %p611_p4 }
  0x1d   : > { %p615_p12 = por %p614_p13, %p613_p10 }
  0x1f   : > { %p616_p1 = pnand %p615_p12, %p609_p6 }
  0x21   : > { %619 = shalt.err (!%p616_p1)
}
  0x22   : > { %s620_s28 = scalar_lea.vmem %s817_s8, 1024  ;;  %s719_s29 = smov [#allocation2]  }
  0x23   : > { %p621_p2 = scmp.ne.s32.totalorder %s817_s8, %s620_s28  ;;  %s625_s30 = sshll.u32 %s719_s29, 4  ;;  %s626_s30 = int_to_ptr.vmem [resolvable:$false] %s625_s30 }
  0x24   : > { %s627_s4 = scalar_lea.vmem %s626_s30, 2048  ;;  %p628_p9 = scmp.lt.s32.totalorder %s817_s8, %s626_s30 }
  0x25   : > { %p623_p5 = pnand %p621_p2, %p607_p3  ;;  %p629_p4 = scmp.lt.s32.totalorder %s627_s4, %s620_s28 }
  0x27   : > { %p624_p11 = pneg %p623_p5  ;;  %p630_p7 = por %p629_p4, %p628_p9 }
  0x29   : > { %p631_p10 = pnand %p630_p7, %p624_p11 }
  0x2b   : > { %634 = shalt.err (!%p631_p10)
}
  0x2c   : > { %s720_s5 = smov 256   ;;  %s721_s7 = smov 16  }
  0x2d   : > { %539 = dma.hbm_to_vmem [thread:$0]  (!%p821_p0), %s815_s6, 1024, %s817_s8, %s826_s10, %s720_s5, %s720_s5, %s721_s7  }
  0x2e   : > { %p174_p12 = scmp.lt.s32.totalorder %s717_s17, 3  ;;  %p991_p1 = scmp.ge.s32.totalorder %s717_s17, 1 }
  0x30   : > { %p175_p3 = pnand %p991_p1, %p174_p12 }
  0x31   : > { %s858_s11 = sand.u32 (!%p175_p3), 1, %s701_s13  }
  0x32   : > { %178 = sbr.rel (%p175_p3) target bundleno = 309 (0x135), region = 32  ;;  %s511_s18 = sshll.u32 (!%p175_p3), %s858_s11, 6 }
  0x33   : > { %s181_s19 = scalar_lea.sflag (!%p175_p3), [#allocation3], %s858_s11  ;;  %s184_s21 = scalar_lea.vmem (!%p175_p3), [#allocation2], %s511_s18 }
  0x39   : > { %688 = dma.done.wait (%p793_p8), %s181_s19, 1024  }
  0x3a   : > { %690 = vsyncadd (%p793_p8), %s181_s19, 4294966272  ;;  %v722_v0 = vmov 0   ;;  %v211_v1 = vld [vmem:[%s184_s21 + $0x8] sm:$0xff]  ;;  %v213_v2 = vld [vmem:[%s184_s21 + $0x18] sm:$0xff]  ;;  %vm298_vm0 = vcmask 261120   ;;  %s512_s29 = sshll.u32 %s858_s11, 7 }
  0x3b   : > { %343 = vmatprep.mubr.bf16.mxu0 %v722_v0  ;;  %363 = vmatprep.mubr.bf16.mxu1 %v722_v0  ;;  %v210_v3 = vld [vmem:[%s184_s21] sm:$0xff]  ;;  %v219_v4 = vpack.c.bf16 %v213_v2, %v211_v1  ;;  %v212_v5 = vld [vmem:[%s184_s21 + $0x10] sm:$0xff]  ;;  %v215_v6 = vld [vmem:[%s184_s21 + $0x28] sm:$0xff]  ;;  %s907_s30 = scalar_lea.vmem [#allocation5], %s512_s29  ;;  %s527_s4 = sshll.u32 %s709_s15, 11 }
  0x3c   : > { %600 = vset.pattern.permute.xlu1 %v722_v0  ;;  %599 = vset.pattern.permute.xlu0 %v722_v0  ;;  %v217_v7 = vld [vmem:[%s184_s21 + $0x38] sm:$0xff]  ;;  %v218_v8 = vpack.c.bf16 %v212_v5, %v210_v3  ;;  %v214_v10 = vld [vmem:[%s184_s21 + $0x20] sm:$0xff]  ;;  %v216_v11 = vld [vmem:[%s184_s21 + $0x30] sm:$0xff]  ;;  %s416_s5 = sshll.u32 %s907_s30, 4  ;;  %s924_s18 = scalar_lea.hbm %s984_s3, %s527_s4  ;;  %s926_s5 = int_to_ptr.vmem [resolvable:$true] %s416_s5 }
  0x3d   : > { %v221_v9 = vpack.c.bf16 %v217_v7, %v215_v6  ;;  %311 = vmatprep.subr.bf16.mxu0 %v219_v4  ;;  %528 = vmatprep.subr.bf16.mxu1 %v219_v4  ;;  %v220_v12 = vpack.c.bf16 %v216_v11, %v214_v10  ;;  %v232_v13 = vld [vmem:[%s983_s2 + $0x10] sm:$0xff]  ;;  %v601_v14 = vld [vmem:[%s982_s1] sm:$0xff]   ;;  %v233_v17 = vld [vmem:[%s983_s2 + $0x18] sm:$0xff]  ;;  %s401_s19 = scalar_lea.sflag [#allocation4], %s858_s11  ;;  %s635_s21 = scalar_lea.vmem %s926_s5, 2048 }
  0x3e   : > { %312 = vmatpush1.bf16.msra.mxu0 %v218_v8  ;;  %530 = vmatpush1.bf16.msra.mxu1 %v218_v8  ;;  %v602_v15 = vld [vmem:[%s982_s1 + $0x10] sm:$0xff]   ;;  %v230_v16 = vld [vmem:[%s983_s2] sm:$0xff]  ;;  %v231_v18 = vld [vmem:[%s983_s2 + $0x8] sm:$0xff]  ;;  %p636_p8 = scmp.ne.s32.totalorder %s926_s5, %s635_s21  ;;  %p992_p9 = scmp.ne.s32.totalorder %s988_s25, 0 }
  0x3f   : > { %313 = vmatprep.subr.bf16.mxu0 %v221_v9  ;;  %529 = vmatprep.subr.bf16.mxu1 %v221_v9  ;;  %v235_v19 = vld [vmem:[%s983_s2 + $0x28] sm:$0xff]  ;;  %v234_v20 = vld [vmem:[%s983_s2 + $0x20] sm:$0xff]  ;;  %v604_v22 = vld [vmem:[%s982_s1 + $0x18] sm:$0xff]   ;;  %s723_s24 = smov [#allocation5]  }
  0x40   : > { %250 = vperm.xlu1 %600, %v232_v13   ;;  %240 = vperm.xlu0 %599, %v230_v16   ;;  %v603_v21 = vld [vmem:[%s982_s1 + $0x8] sm:$0xff]   ;;  %v237_v23 = vld [vmem:[%s983_s2 + $0x38] sm:$0xff]  ;;  %v236_v24 = vld [vmem:[%s983_s2 + $0x30] sm:$0xff]  ;;  %p637_p11 = pnand %p636_p8, %p992_p9  ;;  %s639_s6 = sshll.u32 %s723_s24, 4  ;;  %s640_s6 = int_to_ptr.vmem [resolvable:$false] %s639_s6 }
  0x41   : > { %s641_s8 = scalar_lea.vmem %s640_s6, 4096  ;;  %p642_p6 = scmp.lt.s32.totalorder %s926_s5, %s640_s6 }
  0x42   : > { %314 = vmatpush1.bf16.msra.mxu0 %v220_v12  ;;  %531 = vmatpush1.bf16.msra.mxu1 %v220_v12  ;;  %p638_p0 = pneg %p637_p11  ;;  %p643_p13 = scmp.lt.s32.totalorder %s641_s8, %s635_s21 }
  0x44   : > { %255 = vperm.xlu1 %600, %v233_v17   ;;  %245 = vperm.xlu0 %599, %v231_v18   ;;  %p644_p2 = por %p643_p13, %p642_p6 }
  0x45   : > { %517 = vmatmul.mubr.msk.bf16.vlgmr.msra.gmra.mrb[0].mxu0 %vm298_vm0, %v601_v14  ;;  %519 = vmatmul.mubr.msk.bf16.vlgmr.msra.gmra.mrb[0].mxu1 %vm298_vm0, %v602_v15 }
  0x46   : > { %353 = vmatprep.mubr.bf16.mxu0 %v722_v0  ;;  %373 = vmatprep.mubr.bf16.mxu1 %v722_v0  ;;  %p645_p5 = pnand %p644_p2, %p638_p0 }
  0x48   : > { %265 = vperm.xlu1 %600, %v235_v19   ;;  %260 = vperm.xlu0 %599, %v234_v20  }
  0x4c   : > { %275 = vperm.xlu1 %600, %v237_v23   ;;  %270 = vperm.xlu0 %599, %v236_v24  }
  0x4d   : > { %518 = vmatmul.mubr.msk.bf16.gmra.mrb[4].mxu0 %vm298_vm0, %v603_v21  ;;  %520 = vmatmul.mubr.msk.bf16.gmra.mrb[4].mxu1 %vm298_vm0, %v604_v22 }
  0xbf   : > { %v251_v25 = vpop.permute.xlu1 %250  ;;  %v241_v26 = vpop.permute.xlu0 %240 }
  0xc3   : > { %v256_v27 = vpop.permute.xlu1 %255  ;;  %v246_v28 = vpop.permute.xlu0 %245 }
  0xc7   : > { %v266_v29 = vpop.permute.xlu1 %265  ;;  %v261_v30 = vpop.permute.xlu0 %260 }
  0xcb   : > { %v276_v47 = vpop.permute.xlu1 %275  ;;  %v271_v48 = vpop.permute.xlu0 %270 }
 0x118   : > { %v345_v31 = vpop.f32.mrb[0].mxu0  ;;  %v365_v32 = vpop.f32.mrb[0].mxu1 }
 0x119   : > { %v346_v33 = vadd.f32 %v345_v31, %v241_v26  ;;  %v366_v34 = vadd.f32 %v365_v32, %v261_v30  ;;  %v347_v35 = vpop.f32.mrb[1].mxu0  ;;  %v367_v36 = vpop.f32.mrb[1].mxu1 }
 0x11a   : > { %v348_v37 = vadd.f32 %v347_v35, %v241_v26  ;;  %v368_v38 = vadd.f32 %v367_v36, %v261_v30  ;;  %v349_v39 = vpop.f32.mrb[2].mxu0  ;;  %v369_v40 = vpop.f32.mrb[2].mxu1 }
 0x11b   : > { %384 = vst [vmem:[%s907_s30] sm:$0xff] %v346_v33  ;;  %392 = vst [vmem:[%s907_s30 + $0x40] sm:$0xff] %v366_v34  ;;  %v350_v41 = vadd.f32 %v349_v39, %v246_v28  ;;  %v370_v42 = vadd.f32 %v369_v40, %v266_v29  ;;  %v351_v43 = vpop.f32.mrb[3].mxu0  ;;  %v371_v44 = vpop.f32.mrb[3].mxu1 }
 0x11c   : > { %385 = vst [vmem:[%s907_s30 + $0x8] sm:$0xff] %v348_v37  ;;  %393 = vst [vmem:[%s907_s30 + $0x48] sm:$0xff] %v368_v38  ;;  %v352_v45 = vadd.f32 %v351_v43, %v246_v28  ;;  %v372_v46 = vadd.f32 %v371_v44, %v266_v29 }
 0x11d   : > { %386 = vst [vmem:[%s907_s30 + $0x10] sm:$0xff] %v350_v41  ;;  %394 = vst [vmem:[%s907_s30 + $0x50] sm:$0xff] %v370_v42 }
 0x11e   : > { %387 = vst [vmem:[%s907_s30 + $0x18] sm:$0xff] %v352_v45  ;;  %395 = vst [vmem:[%s907_s30 + $0x58] sm:$0xff] %v372_v46 }
 0x120   : > { %v355_v49 = vpop.f32.mrb[4].mxu0  ;;  %v375_v50 = vpop.f32.mrb[4].mxu1 }
 0x121   : > { %v356_v51 = vadd.f32 %v355_v49, %v251_v25  ;;  %v376_v52 = vadd.f32 %v375_v50, %v271_v48  ;;  %v357_v53 = vpop.f32.mrb[5].mxu0  ;;  %v377_v54 = vpop.f32.mrb[5].mxu1 }
 0x122   : > { %v358_v55 = vadd.f32 %v357_v53, %v251_v25  ;;  %v378_v56 = vadd.f32 %v377_v54, %v271_v48  ;;  %v359_v57 = vpop.f32.mrb[6].mxu0  ;;  %v379_v58 = vpop.f32.mrb[6].mxu1 }
 0x123   : > { %388 = vst [vmem:[%s907_s30 + $0x20] sm:$0xff] %v356_v51  ;;  %396 = vst [vmem:[%s907_s30 + $0x60] sm:$0xff] %v376_v52  ;;  %v360_v59 = vadd.f32 %v359_v57, %v256_v27  ;;  %v380_v60 = vadd.f32 %v379_v58, %v276_v47  ;;  %v361_v61 = vpop.f32.mrb[7].mxu0  ;;  %v381_v62 = vpop.f32.mrb[7].mxu1 }
 0x124   : > { %389 = vst [vmem:[%s907_s30 + $0x28] sm:$0xff] %v358_v55  ;;  %397 = vst [vmem:[%s907_s30 + $0x68] sm:$0xff] %v378_v56  ;;  %v362_v63 = vadd.f32 %v361_v61, %v256_v27  ;;  %v382_v0 = vadd.f32 %v381_v62, %v276_v47 }
 0x125   : > { %390 = vst [vmem:[%s907_s30 + $0x30] sm:$0xff] %v360_v59  ;;  %398 = vst [vmem:[%s907_s30 + $0x70] sm:$0xff] %v380_v60 }
 0x126   : > { %391 = vst [vmem:[%s907_s30 + $0x38] sm:$0xff] %v362_v63  ;;  %399 = vst [vmem:[%s907_s30 + $0x78] sm:$0xff] %v382_v0 }
 0x127   : > { %648 = shalt.err (!%p645_p5)
}
 0x128   : > { %s649_s9 = scalar_lea.hbm %s924_s18, 2048  ;;  %s653_s23 = scalar_lea.hbm %s984_s3, 4096 }
 0x129   : > { %p650_p4 = scmp.ne.s32.totalorder %s924_s18, %s649_s9  ;;  %p654_p12 = scmp.lt.u32.totalorder %s924_s18, %s984_s3 }
 0x12a   : > { %p655_p1 = scmp.lt.u32.totalorder %s653_s23, %s649_s9  ;;  %p657_p8 = scmp.lt.u32.totalorder %s649_s9, %s924_s18 }
 0x12b   : > { %p651_p7 = pnand %p650_p4, %p992_p9 }
 0x12c   : > { %p656_p3 = por %p655_p1, %p654_p12 }
 0x12d   : > { %p652_p10 = pneg %p651_p7 }
 0x12e   : > { %p658_p11 = por %p657_p8, %p656_p3 }
 0x130   : > { %p659_p0 = pnand %p658_p11, %p652_p10 }
 0x132   : > { %662 = shalt.err (!%p659_p0)
}
 0x133   : > { %s724_s30 = smov 256   ;;  %s725_s4 = smov 16  }
 0x134   : > { %534 = dma.vmem_to_hbm [thread:$0]  (%p992_p9), %s926_s5, 2048, %s924_s18, %s401_s19, %s724_s30, %s724_s30, %s725_s4  }
 0x135 PF: > { %s431_s15 = sand.u32 1, %s697_s12   ;;  %p993_p6 = scmp.ne.s32.totalorder %s989_s27, 0 }
 0x136   : > { %p994_p13 = scmp.ge.s32.totalorder %s717_s17, 2  ;;  %s432_s7 = scalar_lea.sflag [#allocation4], %s431_s15 }
 0x138   : > { %p541_p2 = pnand %p994_p13, %p993_p6 }
 0x13a   : > { %692 = dma.done.wait (!%p541_p2), %s432_s7, 2048  }
 0x13b   : > { %694 = vsyncadd (!%p541_p2), %s432_s7, 4294965248  ;;  %s19_s17 = sadd.s32 1, %s717_s17   ;;  %s995_s12 = smov %s701_s13 }
 0x13c   : > { %p16_p5 = scmp.ge.s32.totalorder %s19_s17, 4   ;;  %s996_s13 = smov %s705_s14 }
 0x13d   : > { %s997_s14 = smov %s802_s26  ;;  %s998_s15 = smov %s713_s16 }
 0x13e   : > { %s999_s16 = smov %s1001_s20  ;;  %18 = sbr.rel (!%p16_p5) target bundleno = 6 (0x6), region = 77 }
 0x145   :  { %437 = vsyncpa [#allocation3], 1 }
 0x146   :  { %439 = vsyncpa [#allocation3 + $0x1], 1 }
 0x147   :  { %440 = vsyncpa [#allocation4], 1 }
 0x148   :  { %442 = vsyncpa [#allocation4 + $0x1], 1 }

// kernel: tpu_custom_call.1
= control target key start
LH: loop header
LB: loop body
LE: loop exit
PB: predicated region body
PF: predicated region fallthrough
CT: control target
= control target key end

     0   :  { %8 = vsyncpa [#allocation3], 0  ;;  %s981_s0 = inlined_call_operand.hbm [shape: f32[2,32,256], index: 0, kind: input, shape index: {}]   ;;  %s982_s1 = inlined_call_operand.vmem [shape: bf16[64,32], index: 1, kind: input, shape index: {}]   ;;  %s983_s2 = inlined_call_operand.vmem [shape: f32[64,1], index: 2, kind: input, shape index: {}]   ;;  %s984_s3 = inlined_call_operand.hbm [shape: f32[2,64,256], index: 3, kind: output, shape index: {}]  }
   0x1   :  { %10 = vsyncpa [#allocation3 + $0x1], 0 }
   0x2   :  { %11 = vsyncpa [#allocation4], 0 }
   0x3   :  { %13 = vsyncpa [#allocation4 + $0x1], 0  ;;  %s746_s12 = smov 0   ;;  %s748_s13 = smov 0  }
   0x4   :  { %s750_s14 = smov 0   ;;  %s752_s15 = smov 0  }
   0x5   :  { %s754_s16 = smov 0   ;;  %s756_s17 = smov 0  }
   0x6 LB: > { %s503_s18 = sadd.s32 4294967295, %s717_s17   ;;  %s504_s19 = sadd.s32 4294967294, %s717_s17   ;;  %s717_s17 = sphi %s756_s17, %s19_s17   ;;  %s713_s16 = sphi %s754_s16, %s999_s16   ;;  %s709_s15 = sphi %s752_s15, %s998_s15   ;;  %s705_s14 = sphi %s750_s14, %s997_s14   ;;  %s701_s13 = sphi %s748_s13, %s996_s13   ;;  %s697_s12 = sphi %s746_s12, %s995_s12  }
   0x7   : > { %s31_s20 = sadd.s32 1, %s713_s16  ;;  %s40_s21 = sadd.s32 1, %s705_s14 }
   0x8   : > { %p33_p0 = scmp.ge.s32.totalorder %s31_s20, 2  ;;  %p47_p1 = scmp.ne.s32.totalorder %s705_s14, %s701_s13 }
   0x9   : > { %p48_p2 = scmp.eq.s32.totalorder %s717_s17, 0  ;;  %p53_p3 = scmp.ne.s32.totalorder %s701_s13, %s697_s12 }
   0xa   : > { %s1001_s20 = smov (%p33_p0, %s31_s20), 0  ;;  %p54_p5 = scmp.eq.s32.totalorder %s503_s18, 0 }
   0xb   : > { %p787_p4 = por %p48_p2, %p47_p1  ;;  %s35_s23 = ssub.s32 %s713_s16, %s1001_s20 }
   0xc   : > { %p121_p6 = scmp.eq.s32.totalorder %s503_s18, 1  ;;  %p38_p7 = scmp.eq.s32.totalorder %s35_s23, 0 }
   0xd   : > { %p793_p8 = por %p54_p5, %p53_p3  ;;  %p127_p10 = scmp.eq.s32.totalorder %s504_s19, 1 }
   0xe   : > { %p797_p9 = por %p121_p6, %p47_p1  ;;  %p544_p13 = scmp.lt.s32.totalorder %s717_s17, 2 }
   0xf   : > { %s802_s26 = scalar_select %p38_p7, %s705_s14, %s40_s21  }
  0x10   : > { %s988_s25 = scalar_select %p797_p9, 1, 0 }
  0x11   : > { %p804_p11 = por %p127_p10, %p53_p3  ;;  %s153_s28 = sand.u32 1, %s705_s14  }
  0x12   : > { %s507_s29 = sshll.u32 %s153_s28, 6  ;;  %s526_s30 = sshll.u32 %s713_s16, 10 }
  0x13   : > { %s989_s27 = scalar_select %p804_p11, 1, 0 }
  0x14   : > { %s815_s6 = scalar_lea.hbm %s981_s0, %s526_s30  ;;  %s157_s7 = scalar_lea.vmem [#allocation2], %s507_s29 }
  0x15   : > { %s166_s8 = sshll.u32 %s157_s7, 4  ;;  %p821_p0 = pnand %p544_p13, %p787_p4  ;;  %s817_s8 = int_to_ptr.vmem [resolvable:$true] %s166_s8 }
  0x16   : > { %s826_s10 = scalar_lea.sflag [#allocation3], %s153_s28  ;;  %s605_s11 = scalar_lea.hbm %s815_s6, 1024 }
  0x17   : > { %p606_p2 = scmp.ne.s32.totalorder %s815_s6, %s605_s11  ;;  %p607_p3 = pneg %p821_p0 }
  0x18   : > { %s610_s21 = scalar_lea.hbm %s981_s0, 2048  ;;  %p611_p4 = scmp.lt.u32.totalorder %s815_s6, %s981_s0 }
  0x19   : > { %p608_p5 = pnand %p607_p3, %p606_p2  ;;  %p612_p7 = scmp.lt.u32.totalorder %s610_s21, %s605_s11 }
  0x1a   : > { %p614_p13 = scmp.lt.u32.totalorder %s605_s11, %s815_s6 }
  0x1b   : > { %p609_p6 = pneg %p608_p5  ;;  %p613_p10 = por %p612_p7, %p611_p4 }
  0x1d   : > { %p615_p12 = por %p614_p13, %p613_p10 }
  0x1f   : > { %p616_p1 = pnand %p615_p12, %p609_p6 }
  0x21   : > { %619 = shalt.err (!%p616_p1)
}
  0x22   : > { %s620_s28 = scalar_lea.vmem %s817_s8, 1024  ;;  %s719_s29 = smov [#allocation2]  }
  0x23   : > { %p621_p2 = scmp.ne.s32.totalorder %s817_s8, %s620_s28  ;;  %s625_s30 = sshll.u32 %s719_s29, 4  ;;  %s626_s30 = int_to_ptr.vmem [resolvable:$false] %s625_s30 }
  0x24   : > { %s627_s4 = scalar_lea.vmem %s626_s30, 2048  ;;  %p628_p9 = scmp.lt.s32.totalorder %s817_s8, %s626_s30 }
  0x25   : > { %p623_p5 = pnand %p621_p2, %p607_p3  ;;  %p629_p4 = scmp.lt.s32.totalorder %s627_s4, %s620_s28 }
  0x27   : > { %p624_p11 = pneg %p623_p5  ;;  %p630_p7 = por %p629_p4, %p628_p9 }
  0x29   : > { %p631_p10 = pnand %p630_p7, %p624_p11 }
  0x2b   : > { %634 = shalt.err (!%p631_p10)
}
  0x2c   : > { %s720_s5 = smov 256   ;;  %s721_s7 = smov 16  }
  0x2d   : > { %539 = dma.hbm_to_vmem [thread:$0]  (!%p821_p0), %s815_s6, 1024, %s817_s8, %s826_s10, %s720_s5, %s720_s5, %s721_s7  }
  0x2e   : > { %p174_p12 = scmp.lt.s32.totalorder %s717_s17, 3  ;;  %p991_p1 = scmp.ge.s32.totalorder %s717_s17, 1 }
  0x30   : > { %p175_p3 = pnand %p991_p1, %p174_p12 }
  0x31   : > { %s858_s11 = sand.u32 (!%p175_p3), 1, %s701_s13  }
  0x32   : > { %178 = sbr.rel (%p175_p3) target bundleno = 309 (0x135), region = 32  ;;  %s511_s18 = sshll.u32 (!%p175_p3), %s858_s11, 6 }
  0x33   : > { %s181_s19 = scalar_lea.sflag (!%p175_p3), [#allocation3], %s858_s11  ;;  %s184_s21 = scalar_lea.vmem (!%p175_p3), [#allocation2], %s511_s18 }
  0x39   : > { %688 = dma.done.wait (%p793_p8), %s181_s19, 1024  }
  0x3a   : > { %690 = vsyncadd (%p793_p8), %s181_s19, 4294966272  ;;  %v722_v0 = vmov 0   ;;  %v211_v1 = vld [vmem:[%s184_s21 + $0x8] sm:$0xff]  ;;  %v213_v2 = vld [vmem:[%s184_s21 + $0x18] sm:$0xff]  ;;  %vm298_vm0 = vcmask 261120   ;;  %s512_s29 = sshll.u32 %s858_s11, 7 }
  0x3b   : > { %343 = vmatprep.mubr.bf16.mxu0 %v722_v0  ;;  %363 = vmatprep.mubr.bf16.mxu1 %v722_v0  ;;  %v210_v3 = vld [vmem:[%s184_s21] sm:$0xff]  ;;  %v219_v4 = vpack.c.bf16 %v213_v2, %v211_v1  ;;  %v212_v5 = vld [vmem:[%s184_s21 + $0x10] sm:$0xff]  ;;  %v215_v6 = vld [vmem:[%s184_s21 + $0x28] sm:$0xff]  ;;  %s907_s30 = scalar_lea.vmem [#allocation5], %s512_s29  ;;  %s527_s4 = sshll.u32 %s709_s15, 11 }
  0x3c   : > { %600 = vset.pattern.permute.xlu1 %v722_v0  ;;  %599 = vset.pattern.permute.xlu0 %v722_v0  ;;  %v217_v7 = vld [vmem:[%s184_s21 + $0x38] sm:$0xff]  ;;  %v218_v8 = vpack.c.bf16 %v212_v5, %v210_v3  ;;  %v214_v10 = vld [vmem:[%s184_s21 + $0x20] sm:$0xff]  ;;  %v216_v11 = vld [vmem:[%s184_s21 + $0x30] sm:$0xff]  ;;  %s416_s5 = sshll.u32 %s907_s30, 4  ;;  %s924_s18 = scalar_lea.hbm %s984_s3, %s527_s4  ;;  %s926_s5 = int_to_ptr.vmem [resolvable:$true] %s416_s5 }
  0x3d   : > { %v221_v9 = vpack.c.bf16 %v217_v7, %v215_v6  ;;  %311 = vmatprep.subr.bf16.mxu0 %v219_v4  ;;  %528 = vmatprep.subr.bf16.mxu1 %v219_v4  ;;  %v220_v12 = vpack.c.bf16 %v216_v11, %v214_v10  ;;  %v232_v13 = vld [vmem:[%s983_s2 + $0x10] sm:$0xff]  ;;  %v601_v14 = vld [vmem:[%s982_s1] sm:$0xff]   ;;  %v233_v17 = vld [vmem:[%s983_s2 + $0x18] sm:$0xff]  ;;  %s401_s19 = scalar_lea.sflag [#allocation4], %s858_s11  ;;  %s635_s21 = scalar_lea.vmem %s926_s5, 2048 }
  0x3e   : > { %312 = vmatpush1.bf16.msra.mxu0 %v218_v8  ;;  %530 = vmatpush1.bf16.msra.mxu1 %v218_v8  ;;  %v602_v15 = vld [vmem:[%s982_s1 + $0x10] sm:$0xff]   ;;  %v230_v16 = vld [vmem:[%s983_s2] sm:$0xff]  ;;  %v231_v18 = vld [vmem:[%s983_s2 + $0x8] sm:$0xff]  ;;  %p636_p8 = scmp.ne.s32.totalorder %s926_s5, %s635_s21  ;;  %p992_p9 = scmp.ne.s32.totalorder %s988_s25, 0 }
  0x3f   : > { %313 = vmatprep.subr.bf16.mxu0 %v221_v9  ;;  %529 = vmatprep.subr.bf16.mxu1 %v221_v9  ;;  %v235_v19 = vld [vmem:[%s983_s2 + $0x28] sm:$0xff]  ;;  %v234_v20 = vld [vmem:[%s983_s2 + $0x20] sm:$0xff]  ;;  %v604_v22 = vld [vmem:[%s982_s1 + $0x18] sm:$0xff]   ;;  %s723_s24 = smov [#allocation5]  }
  0x40   : > { %250 = vperm.xlu1 %600, %v232_v13   ;;  %240 = vperm.xlu0 %599, %v230_v16   ;;  %v603_v21 = vld [vmem:[%s982_s1 + $0x8] sm:$0xff]   ;;  %v237_v23 = vld [vmem:[%s983_s2 + $0x38] sm:$0xff]  ;;  %v236_v24 = vld [vmem:[%s983_s2 + $0x30] sm:$0xff]  ;;  %p637_p11 = pnand %p636_p8, %p992_p9  ;;  %s639_s6 = sshll.u32 %s723_s24, 4  ;;  %s640_s6 = int_to_ptr.vmem [resolvable:$false] %s639_s6 }
  0x41   : > { %s641_s8 = scalar_lea.vmem %s640_s6, 4096  ;;  %p642_p6 = scmp.lt.s32.totalorder %s926_s5, %s640_s6 }
  0x42   : > { %314 = vmatpush1.bf16.msra.mxu0 %v220_v12  ;;  %531 = vmatpush1.bf16.msra.mxu1 %v220_v12  ;;  %p638_p0 = pneg %p637_p11  ;;  %p643_p13 = scmp.lt.s32.totalorder %s641_s8, %s635_s21 }
  0x44   : > { %255 = vperm.xlu1 %600, %v233_v17   ;;  %245 = vperm.xlu0 %599, %v231_v18   ;;  %p644_p2 = por %p643_p13, %p642_p6 }
  0x45   : > { %517 = vmatmul.mubr.msk.bf16.vlgmr.msra.gmra.mrb[0].mxu0 %vm298_vm0, %v601_v14  ;;  %519 = vmatmul.mubr.msk.bf16.vlgmr.msra.gmra.mrb[0].mxu1 %vm298_vm0, %v602_v15 }
  0x46   : > { %353 = vmatprep.mubr.bf16.mxu0 %v722_v0  ;;  %373 = vmatprep.mubr.bf16.mxu1 %v722_v0  ;;  %p645_p5 = pnand %p644_p2, %p638_p0 }
  0x48   : > { %265 = vperm.xlu1 %600, %v235_v19   ;;  %260 = vperm.xlu0 %599, %v234_v20  }
  0x4c   : > { %275 = vperm.xlu1 %600, %v237_v23   ;;  %270 = vperm.xlu0 %599, %v236_v24  }
  0x4d   : > { %518 = vmatmul.mubr.msk.bf16.gmra.mrb[4].mxu0 %vm298_vm0, %v603_v21  ;;  %520 = vmatmul.mubr.msk.bf16.gmra.mrb[4].mxu1 %vm298_vm0, %v604_v22 }
  0xbf   : > { %v251_v25 = vpop.permute.xlu1 %250  ;;  %v241_v26 = vpop.permute.xlu0 %240 }
  0xc3   : > { %v256_v27 = vpop.permute.xlu1 %255  ;;  %v246_v28 = vpop.permute.xlu0 %245 }
  0xc7   : > { %v266_v29 = vpop.permute.xlu1 %265  ;;  %v261_v30 = vpop.permute.xlu0 %260 }
  0xcb   : > { %v276_v47 = vpop.permute.xlu1 %275  ;;  %v271_v48 = vpop.permute.xlu0 %270 }
 0x118   : > { %v345_v31 = vpop.f32.mrb[0].mxu0  ;;  %v365_v32 = vpop.f32.mrb[0].mxu1 }
 0x119   : > { %v346_v33 = vadd.f32 %v345_v31, %v241_v26  ;;  %v366_v34 = vadd.f32 %v365_v32, %v261_v30  ;;  %v347_v35 = vpop.f32.mrb[1].mxu0  ;;  %v367_v36 = vpop.f32.mrb[1].mxu1 }
 0x11a   : > { %v348_v37 = vadd.f32 %v347_v35, %v241_v26  ;;  %v368_v38 = vadd.f32 %v367_v36, %v261_v30  ;;  %v349_v39 = vpop.f32.mrb[2].mxu0  ;;  %v369_v40 = vpop.f32.mrb[2].mxu1 }
 0x11b   : > { %384 = vst [vmem:[%s907_s30] sm:$0xff] %v346_v33  ;;  %392 = vst [vmem:[%s907_s30 + $0x40] sm:$0xff] %v366_v34  ;;  %v350_v41 = vadd.f32 %v349_v39, %v246_v28  ;;  %v370_v42 = vadd.f32 %v369_v40, %v266_v29  ;;  %v351_v43 = vpop.f32.mrb[3].mxu0  ;;  %v371_v44 = vpop.f32.mrb[3].mxu1 }
 0x11c   : > { %385 = vst [vmem:[%s907_s30 + $0x8] sm:$0xff] %v348_v37  ;;  %393 = vst [vmem:[%s907_s30 + $0x48] sm:$0xff] %v368_v38  ;;  %v352_v45 = vadd.f32 %v351_v43, %v246_v28  ;;  %v372_v46 = vadd.f32 %v371_v44, %v266_v29 }
 0x11d   : > { %386 = vst [vmem:[%s907_s30 + $0x10] sm:$0xff] %v350_v41  ;;  %394 = vst [vmem:[%s907_s30 + $0x50] sm:$0xff] %v370_v42 }
 0x11e   : > { %387 = vst [vmem:[%s907_s30 + $0x18] sm:$0xff] %v352_v45  ;;  %395 = vst [vmem:[%s907_s30 + $0x58] sm:$0xff] %v372_v46 }
 0x120   : > { %v355_v49 = vpop.f32.mrb[4].mxu0  ;;  %v375_v50 = vpop.f32.mrb[4].mxu1 }
 0x121   : > { %v356_v51 = vadd.f32 %v355_v49, %v251_v25  ;;  %v376_v52 = vadd.f32 %v375_v50, %v271_v48  ;;  %v357_v53 = vpop.f32.mrb[5].mxu0  ;;  %v377_v54 = vpop.f32.mrb[5].mxu1 }
 0x122   : > { %v358_v55 = vadd.f32 %v357_v53, %v251_v25  ;;  %v378_v56 = vadd.f32 %v377_v54, %v271_v48  ;;  %v359_v57 = vpop.f32.mrb[6].mxu0  ;;  %v379_v58 = vpop.f32.mrb[6].mxu1 }
 0x123   : > { %388 = vst [vmem:[%s907_s30 + $0x20] sm:$0xff] %v356_v51  ;;  %396 = vst [vmem:[%s907_s30 + $0x60] sm:$0xff] %v376_v52  ;;  %v360_v59 = vadd.f32 %v359_v57, %v256_v27  ;;  %v380_v60 = vadd.f32 %v379_v58, %v276_v47  ;;  %v361_v61 = vpop.f32.mrb[7].mxu0  ;;  %v381_v62 = vpop.f32.mrb[7].mxu1 }
 0x124   : > { %389 = vst [vmem:[%s907_s30 + $0x28] sm:$0xff] %v358_v55  ;;  %397 = vst [vmem:[%s907_s30 + $0x68] sm:$0xff] %v378_v56  ;;  %v362_v63 = vadd.f32 %v361_v61, %v256_v27  ;;  %v382_v0 = vadd.f32 %v381_v62, %v276_v47 }
 0x125   : > { %390 = vst [vmem:[%s907_s30 + $0x30] sm:$0xff] %v360_v59  ;;  %398 = vst [vmem:[%s907_s30 + $0x70] sm:$0xff] %v380_v60 }
 0x126   : > { %391 = vst [vmem:[%s907_s30 + $0x38] sm:$0xff] %v362_v63  ;;  %399 = vst [vmem:[%s907_s30 + $0x78] sm:$0xff] %v382_v0 }
 0x127   : > { %648 = shalt.err (!%p645_p5)
}
 0x128   : > { %s649_s9 = scalar_lea.hbm %s924_s18, 2048  ;;  %s653_s23 = scalar_lea.hbm %s984_s3, 4096 }
 0x129   : > { %p650_p4 = scmp.ne.s32.totalorder %s924_s18, %s649_s9  ;;  %p654_p12 = scmp.lt.u32.totalorder %s924_s18, %s984_s3 }
 0x12a   : > { %p655_p1 = scmp.lt.u32.totalorder %s653_s23, %s649_s9  ;;  %p657_p8 = scmp.lt.u32.totalorder %s649_s9, %s924_s18 }
 0x12b   : > { %p651_p7 = pnand %p650_p4, %p992_p9 }
 0x12c   : > { %p656_p3 = por %p655_p1, %p654_p12 }
 0x12d   : > { %p652_p10 = pneg %p651_p7 }
 0x12e   : > { %p658_p11 = por %p657_p8, %p656_p3 }
 0x130   : > { %p659_p0 = pnand %p658_p11, %p652_p10 }
 0x132   : > { %662 = shalt.err (!%p659_p0)
}
 0x133   : > { %s724_s30 = smov 256   ;;  %s725_s4 = smov 16  }
 0x134   : > { %534 = dma.vmem_to_hbm [thread:$0]  (%p992_p9), %s926_s5, 2048, %s924_s18, %s401_s19, %s724_s30, %s724_s30, %s725_s4  }
 0x135 PF: > { %s431_s15 = sand.u32 1, %s697_s12   ;;  %p993_p6 = scmp.ne.s32.totalorder %s989_s27, 0 }
 0x136   : > { %p994_p13 = scmp.ge.s32.totalorder %s717_s17, 2  ;;  %s432_s7 = scalar_lea.sflag [#allocation4], %s431_s15 }
 0x138   : > { %p541_p2 = pnand %p994_p13, %p993_p6 }
 0x13a   : > { %692 = dma.done.wait (!%p541_p2), %s432_s7, 2048  }
 0x13b   : > { %694 = vsyncadd (!%p541_p2), %s432_s7, 4294965248  ;;  %s19_s17 = sadd.s32 1, %s717_s17   ;;  %s995_s12 = smov %s701_s13 }
 0x13c   : > { %p16_p5 = scmp.ge.s32.totalorder %s19_s17, 4   ;;  %s996_s13 = smov %s705_s14 }
 0x13d   : > { %s997_s14 = smov %s802_s26  ;;  %s998_s15 = smov %s713_s16 }
 0x13e   : > { %s999_s16 = smov %s1001_s20  ;;  %18 = sbr.rel (!%p16_p5) target bundleno = 6 (0x6), region = 77 }
 0x145   :  { %437 = vsyncpa [#allocation3], 1 }
 0x146   :  { %439 = vsyncpa [#allocation3 + $0x1], 1 }
 0x147   :  { %440 = vsyncpa [#allocation4], 1 }
 0x148   :  { %442 = vsyncpa [#allocation4 + $0x1], 1 }

</bundles_post_ra>
